<compile_context>
chip_gen: v5e
topology: v5e:2x2
jax: 0.10.0
libtpu: 0.0.40
codegen_flags: <defaults>
</compile_context>

<pallas_src>
import functools

import jax
import jax.numpy as jnp
from jax.experimental import pallas as pl
from jax.experimental.pallas import tpu as pltpu


# -----------------------------------------------------------------------------
# Exact GELU usable inside Mosaic kernels: erf via Abramowitz-Stegun 7.1.26
# polynomial (|err| <= 1.5e-7, i.e. matches torch's exact GELU at f32).
# -----------------------------------------------------------------------------
_ERF_A1 = 0.254829592
_ERF_A2 = -0.284496736
_ERF_A3 = 1.421413741
_ERF_A4 = -1.453152027
_ERF_A5 = 1.061405429
_ERF_P = 0.3275911
_INV_SQRT2 = 0.7071067811865476


def _erf_poly(x):
    sgn = jnp.where(x >= 0.0, 1.0, -1.0)
    ax = jnp.abs(x)
    t = 1.0 / (1.0 + _ERF_P * ax)
    poly = t * (_ERF_A1 + t * (_ERF_A2 + t * (_ERF_A3 + t * (_ERF_A4 + t * _ERF_A5))))
    return sgn * (1.0 - poly * jnp.exp(-ax * ax))


def _gelu_exact(x):
    return 0.5 * x * (1.0 + _erf_poly(x * _INV_SQRT2))


# -----------------------------------------------------------------------------
# Fused Pallas Conv1d kernel: NCL in / NCL out, one MXU pass per tile.
#   optional prologue : a = GELU(x * bn_scale + bn_shift)   (previous BN+GELU)
#   conv              : stride-1, K in {1, odd "same"}; zero-padding folded in
#   optional epilogue : + residual tile
#   optional stats    : per-tile (sum, sumsq) of the conv output per channel
# -----------------------------------------------------------------------------
def _conv1d_fused_kernel(*refs, K, P, C_in, C_out, TL, L_in, single_tile,
                         has_prologue, has_residual, want_stats):
    it = iter(refs)
    x_ref = next(it)                       # (1, C_in, L_in)   full row, L on lanes
    w_ref = next(it)                       # (K*C_out, C_in)   tap-stacked weights
    b_ref = next(it)                       # (C_out, 1)
    s_ref = next(it) if has_prologue else None   # (C_in, 1) BN scale
    t_ref = next(it) if has_prologue else None   # (C_in, 1) BN shift
    r_ref = next(it) if has_residual else None   # (1, C_out, TL) residual tile
    o_ref = next(it)                       # (1, C_out, TL)
    st_ref = next(it) if want_stats else None    # (1, 1, C_out, 2)

    def act(v):
        v = v.astype(jnp.float32)
        if not has_prologue:
            return v
        return _gelu_exact(v * s_ref[...] + t_ref[...])

    if single_tile:
        # TL == L_in: the whole row is the tile; halo columns are exactly the
        # conv's zero padding, so no dynamic loads needed.
        a0 = act(x_ref[0])                                     # (C_in, TL)
        if K == 1:
            a_win = a0
        else:
            zcol = jnp.zeros((C_in, P), jnp.float32)
            a_win = jnp.concatenate([zcol, a0, zcol], axis=1)  # (C_in, TL+2P)
    else:
        start = pl.program_id(1) * TL
        if TL % 128 == 0:
            start = pl.multiple_of(start, 128)
        a0 = act(x_ref[0, :, pl.ds(start, TL)])                # (C_in, TL)
        if K == 1:
            a_win = a0
        else:
            # Cross-tile halo columns (the conv's own zero padding at the true
            # sequence edges, real neighbours otherwise).
            left_start = jnp.maximum(start - P, 0)
            right_start = jnp.minimum(start + TL, L_in - P)
            al = jnp.where(start > 0,
                           act(x_ref[0, :, pl.ds(left_start, P)]), 0.0)
            ar = jnp.where(start + TL < L_in,
                           act(x_ref[0, :, pl.ds(right_start, P)]), 0.0)
            a_win = jnp.concatenate([al, a0, ar], axis=1)      # (C_in, TL+2P)

    # One MXU pass for all K taps: rows [k*C_out:(k+1)*C_out] of z hold tap k.
    z = jnp.dot(w_ref[...], a_win, preferred_element_type=jnp.float32)

    acc = z[0:C_out, 0:TL]
    for k in range(1, K):                                      # K tiny & static
        acc = acc + z[k * C_out:(k + 1) * C_out, k:k + TL]
    acc = acc + b_ref[...]                                     # (C_out,1) bcast

    if want_stats:
        st_ref[0, 0] = jnp.concatenate(
            [jnp.sum(acc, axis=1, keepdims=True),
             jnp.sum(acc * acc, axis=1, keepdims=True)], axis=1)  # (C_out, 2)

    if has_residual:
        acc = acc + r_ref[0].astype(jnp.float32)

    o_ref[0] = acc.astype(o_ref.dtype)


def _choose_l_tile(l_out, max_tl=8192):
    """Full length if it fits; otherwise a 128-multiple divisor of L_out so
    output tiles stay lane-aligned and VMEM is bounded independent of L."""
    if l_out <= max_tl:
        return l_out
    t = (max_tl // 128) * 128
    while t >= 128:
        if l_out % t == 0:
            return t
        t -= 128
    # TODO(synk): non-divisible very long sequences fall back to a single
    # full-length tile; a halo-tiled manual-DMA path would bound VMEM there.
    return l_out


def conv1d_fused(x, weight, bias=None, *, stride=1, padding=0,
                 bn_scale=None, bn_shift=None, residual=None,
                 want_stats=False, max_tl=8192):
    """torch.nn.Conv1d forward with optional fused BN(scale,shift)+GELU
    prologue, fused residual add, and fused per-channel (sum, sumsq) stats.

    x: (N, C_in, L); weight: (C_out, C_in, K); bias: (C_out,) or None.
    Returns (N, C_out, L_out)   [ + stats (N, n_tiles, C_out, 2) if want_stats ].
    """
    N, C_in, L = x.shape
    C_out, c_in_w, K = weight.shape
    assert c_in_w == C_in
    has_prologue = bn_scale is not None
    if has_prologue:
        assert bn_shift is not None

    if stride > 1:
        # Fold the stride into the channel axis so the kernel only ever sees
        # stride-1 convs (k=2,s=2 downsample becomes a 1x1 over 2*C channels).
        # TODO(synk): could be eliminated by emitting the producer's output in
        # phase-split layout; kept as a single cheap XLA copy for now.
        assert not has_prologue, "prologue + stride fold not used by this model"
        s = stride
        L_out = (L + 2 * padding - K) // s + 1
        assert L_out > 0
        K_f = -(-K // s)
        assert K_f == 1, "only k<=stride downsamples are folded (k=2,s=2 here)"
        L_f = L_out + K_f - 1
        x_p = x
        if padding > 0:
            x_p = jnp.pad(x_p, ((0, 0), (0, 0), (padding, padding)))
        need, have = L_f * s, x_p.shape[-1]
        if need > have:
            x_p = jnp.pad(x_p, ((0, 0), (0, 0), (0, need - have)))
        elif need < have:
            x_p = x_p[:, :, :need]
        x_p = x_p.reshape(N, C_in, L_f, s).transpose(0, 1, 3, 2)
        x = x_p.reshape(N, C_in * s, L_f)
        w_p = jnp.pad(weight, ((0, 0), (0, 0), (0, K_f * s - K)))
        weight = w_p.reshape(C_out, C_in, K_f, s).transpose(0, 1, 3, 2)
        weight = weight.reshape(C_out, C_in * s, K_f)
        C_in, K, padding = C_in * s, K_f, 0
    else:
        L_out = L + 2 * padding - K + 1
        assert 2 * padding == K - 1, "stride-1 path expects K=1 or 'same' odd K"

    P = (K - 1) // 2
    L_in = x.shape[-1]
    assert L_in == L_out                      # both code paths guarantee this

    TL = _choose_l_tile(L_out, max_tl)
    n_lt = max(L_out // TL, 1)
    single_tile = (n_lt == 1)

    # Tap-stacked weights: w_stk[k*C_out + co, ci] = w[co, ci, k]
    w_stk = jnp.transpose(weight, (2, 0, 1)).reshape(K * C_out, C_in)
    w_stk = w_stk.astype(x.dtype)
    if bias is None:
        bias = jnp.zeros((C_out,), jnp.float32)
    b2d = bias.reshape(C_out, 1).astype(jnp.float32)

    inputs = [x, w_stk, b2d]
    in_specs = [
        # Whole (unpadded) row per batch; constant index over the L-tile axis
        # so it is not re-DMA'd per tile.  Channel counts are tiny.
        pl.BlockSpec((1, C_in, L_in), lambda n, j: (n, 0, 0)),
        pl.BlockSpec((K * C_out, C_in), lambda n, j: (0, 0)),
        pl.BlockSpec((C_out, 1), lambda n, j: (0, 0)),
    ]
    if has_prologue:
        inputs += [jnp.asarray(bn_scale).reshape(C_in, 1).astype(jnp.float32),
                   jnp.asarray(bn_shift).reshape(C_in, 1).astype(jnp.float32)]
        in_specs += [pl.BlockSpec((C_in, 1), lambda n, j: (0, 0)),
                     pl.BlockSpec((C_in, 1), lambda n, j: (0, 0))]
    has_residual = residual is not None
    if has_residual:
        assert residual.shape == (N, C_out, L_out)
        inputs.append(residual)
        in_specs.append(pl.BlockSpec((1, C_out, TL), lambda n, j: (n, 0, j)))

    out_shape = jax.ShapeDtypeStruct((N, C_out, L_out), x.dtype)
    out_specs = pl.BlockSpec((1, C_out, TL), lambda n, j: (n, 0, j))
    if want_stats:
        out_shape = (out_shape,
                     jax.ShapeDtypeStruct((N, n_lt, C_out, 2), jnp.float32))
        out_specs = (out_specs,
                     pl.BlockSpec((1, 1, C_out, 2), lambda n, j: (n, j, 0, 0)))

    kernel = functools.partial(
        _conv1d_fused_kernel, K=K, P=P, C_in=C_in, C_out=C_out, TL=TL,
        L_in=L_in, single_tile=single_tile, has_prologue=has_prologue,
        has_residual=has_residual, want_stats=want_stats)

    return pl.pallas_call(
        kernel,
        out_shape=out_shape,
        grid_spec=pltpu.PrefetchScalarGridSpec(
            num_scalar_prefetch=0,
            grid=(N, n_lt),
            in_specs=in_specs,
            out_specs=out_specs),
        compiler_params=pltpu.CompilerParams(
            dimension_semantics=("parallel", "parallel"),
            vmem_limit_bytes=32 * 1024 * 1024),
    )(*inputs)


# -----------------------------------------------------------------------------
# Tiny JAX glue: finalize BatchNorm batch statistics from the kernel partials.
# -----------------------------------------------------------------------------
def _bn_affine_from_stats(stats, count, gamma, beta, eps=1e-5):
    # TODO(synk): matches a freshly-constructed torch BatchNorm1d in train()
    # (batch statistics, biased variance); eval()-mode running stats are not
    # modeled.
    s = jnp.sum(stats, axis=(0, 1))                    # (C, 2)
    mean = s[:, 0] / count
    var = jnp.maximum(s[:, 1] / count - mean * mean, 0.0)
    scale = gamma * jax.lax.rsqrt(var + eps)
    shift = beta - mean * scale
    return scale, shift


# -----------------------------------------------------------------------------
# Pure-JAX reference (lax.conv + explicit BN + exact GELU) for verification.
# -----------------------------------------------------------------------------
def conv1d_reference(x, weight, bias=None, *, stride=1, padding=0):
    out = jax.lax.conv_general_dilated(
        x, weight, window_strides=(stride,), padding=[(padding, padding)],
        dimension_numbers=("NCH", "OIH", "NCH"))
    if bias is not None:
        out = out + bias[None, :, None]
    return out


def _batch_norm1d_ref(x, gamma, beta, eps=1e-5):
    mean = jnp.mean(x, axis=(0, 2), keepdims=True)
    var = jnp.mean(jnp.square(x - mean), axis=(0, 2), keepdims=True)
    x_hat = (x - mean) * jax.lax.rsqrt(var + eps)
    return x_hat * gamma[None, :, None] + beta[None, :, None]


def _gelu_ref(x):
    return jax.nn.gelu(x, approximate=False)   # torch.nn.GELU default (exact)


# -----------------------------------------------------------------------------
# TTSMelEncoder (conv_type=0, no weight_norm) parameters + forward passes.
# -----------------------------------------------------------------------------
class HParams:
    n_mels = 4
    enc_dim = 8
    enc_hidden_dim = 16
    n_layers = 2
    n_blocks = 1
    conv_type = 0
    encoder_residual = True


def _init_conv_params(key, c_in, c_out, k):
    kw, kb = jax.random.split(key)
    w = 0.02 * jax.random.normal(kw, (c_out, c_in, k), dtype=jnp.float32)
    bound = 1.0 / float(c_in * k) ** 0.5      # torch default bias init
    b = jax.random.uniform(kb, (c_out,), dtype=jnp.float32,
                           minval=-bound, maxval=bound)
    return {"w": w, "b": b}


def _init_bn_params(c):
    return {"g": jnp.ones((c,), jnp.float32), "b": jnp.zeros((c,), jnp.float32)}


def init_params(key, hp):
    n_keys = 1 + hp.n_layers * (4 * hp.n_blocks + 1)
    keys = iter(jax.random.split(key, n_keys))
    params = {"in_layer": _init_conv_params(next(keys), hp.n_mels, hp.enc_dim, 1),
              "layers": []}
    for _ in range(hp.n_layers):
        blocks = []
        for _ in range(hp.n_blocks):
            blocks.append({
                "c1": _init_conv_params(next(keys), hp.enc_dim, hp.enc_hidden_dim, 1),
                "bn1": _init_bn_params(hp.enc_hidden_dim),
                "c2": _init_conv_params(next(keys), hp.enc_hidden_dim, hp.enc_hidden_dim, 3),
                "bn2": _init_bn_params(hp.enc_hidden_dim),
                "c3": _init_conv_params(next(keys), hp.enc_hidden_dim, hp.enc_hidden_dim, 3),
                "bn3": _init_bn_params(hp.enc_hidden_dim),
                "c4": _init_conv_params(next(keys), hp.enc_hidden_dim, hp.enc_dim, 1),
            })
        down = _init_conv_params(next(keys), hp.enc_dim, hp.enc_dim, 2)
        params["layers"].append({"blocks": blocks, "down": down})
    return params


# --- fused Pallas path --------------------------------------------------------
def conv_block_forward_pallas(p, x, residual_on):
    # ConvBlock(type=0): 1x1 -> BN -> GELU -> k3 -> BN -> GELU -> k3 -> BN ->
    # GELU -> 1x1 (+ residual), with BN/GELU fused as prologues of the next
    # conv and stats emitted by the previous conv.
    N, _, L = x.shape
    cnt = N * L
    y1, st1 = conv1d_fused(x, p["c1"]["w"], p["c1"]["b"], want_stats=True)
    sc1, sh1 = _bn_affine_from_stats(st1, cnt, p["bn1"]["g"], p["bn1"]["b"])
    y2, st2 = conv1d_fused(y1, p["c2"]["w"], p["c2"]["b"], padding=1,
                           bn_scale=sc1, bn_shift=sh1, want_stats=True)
    sc2, sh2 = _bn_affine_from_stats(st2, cnt, p["bn2"]["g"], p["bn2"]["b"])
    y3, st3 = conv1d_fused(y2, p["c3"]["w"], p["c3"]["b"], padding=1,
                           bn_scale=sc2, bn_shift=sh2, want_stats=True)
    sc3, sh3 = _bn_affine_from_stats(st3, cnt, p["bn3"]["g"], p["bn3"]["b"])
    out = conv1d_fused(y3, p["c4"]["w"], p["c4"]["b"],
                       bn_scale=sc3, bn_shift=sh3,
                       residual=(x if residual_on else None))
    return out


def tts_mel_encoder_forward_pallas(params, x, hp):
    x = conv1d_fused(x, params["in_layer"]["w"], params["in_layer"]["b"])
    xs_list = []
    for layer in params["layers"]:
        xs = []
        for blk in layer["blocks"]:
            x = conv_block_forward_pallas(blk, x, hp.encoder_residual)
            xs.append(x)
        xs.reverse()
        xs_list.append(xs)
        x = conv1d_fused(x, layer["down"]["w"], layer["down"]["b"], stride=2)
    xs_list.reverse()
    return xs_list


# --- pure-JAX reference path --------------------------------------------------
def conv_block_forward_ref(p, x, residual_on):
    h = conv1d_reference(x, p["c1"]["w"], p["c1"]["b"])
    h = _gelu_ref(_batch_norm1d_ref(h, p["bn1"]["g"], p["bn1"]["b"]))
    h = conv1d_reference(h, p["c2"]["w"], p["c2"]["b"], padding=1)
    h = _gelu_ref(_batch_norm1d_ref(h, p["bn2"]["g"], p["bn2"]["b"]))
    h = conv1d_reference(h, p["c3"]["w"], p["c3"]["b"], padding=1)
    h = _gelu_ref(_batch_norm1d_ref(h, p["bn3"]["g"], p["bn3"]["b"]))
    h = conv1d_reference(h, p["c4"]["w"], p["c4"]["b"])
    return x + h if residual_on else h


def tts_mel_encoder_forward_ref(params, x, hp):
    x = conv1d_reference(x, params["in_layer"]["w"], params["in_layer"]["b"])
    xs_list = []
    for layer in params["layers"]:
        xs = []
        for blk in layer["blocks"]:
            x = conv_block_forward_ref(blk, x, hp.encoder_residual)
            xs.append(x)
        xs.reverse()
        xs_list.append(xs)
        x = conv1d_reference(x, layer["down"]["w"], layer["down"]["b"], stride=2)
    xs_list.reverse()
    return xs_list


# -----------------------------------------------------------------------------
if __name__ == "__main__":
    hp = HParams()
    assert hp.conv_type == 0  # only the type-0 ConvBlock is instantiated here

    key = jax.random.PRNGKey(0)
    k_params, k_x = jax.random.split(key)
    params = init_params(k_params, hp)

    N, L = 2, 16
    x = jax.random.normal(k_x, (N, hp.n_mels, L), dtype=jnp.float32)

    def _assert_close(name, got, want, atol, rtol):
        assert got.shape == want.shape, (name, got.shape, want.shape)
        ok = jnp.allclose(got, want, atol=atol, rtol=rtol)
        assert bool(ok), (name, float(jnp.max(jnp.abs(got - want))))

    def _mk(seed, shape):
        return jax.random.normal(jax.random.PRNGKey(seed), shape, jnp.float32)

    # --- unit checks of the fused Pallas conv against lax.conv compositions ---
    # 1) plain 1x1 conv
    xx = _mk(1, (N, 4, L)); ww = 0.02 * _mk(2, (8, 4, 1)); bb = 0.1 * _mk(3, (8,))
    _assert_close("k1", conv1d_fused(xx, ww, bb),
                  conv1d_reference(xx, ww, bb), 3e-5, 1e-4)

    # 2) plain k=3, padding=1 conv (padding folded in-kernel)
    xx = _mk(4, (N, 16, L)); ww = 0.02 * _mk(5, (16, 16, 3)); bb = 0.1 * _mk(6, (16,))
    _assert_close("k3p1", conv1d_fused(xx, ww, bb, padding=1),
                  conv1d_reference(xx, ww, bb, padding=1), 3e-5, 1e-4)

    # 3) k=3 conv with fused BN+GELU prologue and fused stats output
    sc = 1.0 + 0.1 * _mk(7, (16,)); sh = 0.1 * _mk(8, (16,))
    got_y, got_st = conv1d_fused(xx, ww, bb, padding=1, bn_scale=sc, bn_shift=sh,
                                 want_stats=True)
    a_ref = _gelu_ref(xx * sc[None, :, None] + sh[None, :, None])
    y_ref = conv1d_reference(a_ref, ww, bb, padding=1)
    _assert_close("k3p1+prologue", got_y, y_ref, 1e-4, 1e-3)
    st_ref = jnp.stack([jnp.sum(y_ref, axis=(0, 2)),
                        jnp.sum(y_ref * y_ref, axis=(0, 2))], axis=1)
    _assert_close("stats", jnp.sum(got_st, axis=(0, 1)), st_ref, 1e-3, 1e-3)

    # 4) k=2, stride=2 downsample
    xx = _mk(9, (N, 8, L)); ww = 0.02 * _mk(10, (8, 8, 2)); bb = 0.1 * _mk(11, (8,))
    _assert_close("k2s2", conv1d_fused(xx, ww, bb, stride=2),
                  conv1d_reference(xx, ww, bb, stride=2), 3e-5, 1e-4)

    # 5) 1x1 conv with prologue + fused residual epilogue
    xx = _mk(12, (N, 16, L)); ww = 0.02 * _mk(13, (8, 16, 1)); bb = 0.1 * _mk(14, (8,))
    sc = 1.0 + 0.1 * _mk(15, (16,)); sh = 0.1 * _mk(16, (16,))
    res = _mk(17, (N, 8, L))
    got = conv1d_fused(xx, ww, bb, bn_scale=sc, bn_shift=sh, residual=res)
    a_ref = _gelu_ref(xx * sc[None, :, None] + sh[None, :, None])
    _assert_close("k1+prologue+res", got,
                  conv1d_reference(a_ref, ww, bb) + res, 1e-4, 1e-3)

    # 6) multi-tile path with cross-tile halos (L=512 forced into 2 tiles)
    xx = _mk(18, (N, 16, 512)); ww = 0.02 * _mk(19, (16, 16, 3)); bb = 0.1 * _mk(20, (16,))
    sc = 1.0 + 0.1 * _mk(21, (16,)); sh = 0.1 * _mk(22, (16,))
    got_y, got_st = conv1d_fused(xx, ww, bb, padding=1, bn_scale=sc, bn_shift=sh,
                                 want_stats=True, max_tl=256)
    a_ref = _gelu_ref(xx * sc[None, :, None] + sh[None, :, None])
    y_ref = conv1d_reference(a_ref, ww, bb, padding=1)
    _assert_close("multitile", got_y, y_ref, 2e-4, 1e-3)
    st_ref = jnp.stack([jnp.sum(y_ref, axis=(0, 2)),
                        jnp.sum(y_ref * y_ref, axis=(0, 2))], axis=1)
    _assert_close("multitile stats", jnp.sum(got_st, axis=(0, 1)), st_ref, 1e-2, 1e-3)

    # --- full TTSMelEncoder forward built on the fused Pallas convolutions ---
    out = tts_mel_encoder_forward_pallas(params, x, hp)
    out = jax.block_until_ready(out)

    # --- end-to-end check vs a pure-JAX forward of the same params ---
    ref_out = tts_mel_encoder_forward_ref(params, x, hp)
    flat_out = jax.tree_util.tree_leaves(out)
    flat_ref = jax.tree_util.tree_leaves(ref_out)
    assert len(flat_out) == len(flat_ref) == hp.n_layers * hp.n_blocks
    expected_shapes = [(N, hp.enc_dim, L // 2), (N, hp.enc_dim, L)]  # deepest first
    for a, b, s in zip(flat_out, flat_ref, expected_shapes):
        assert a.shape == b.shape == s, (a.shape, b.shape, s)
        assert bool(jnp.allclose(a, b, atol=2e-3, rtol=1e-2)), \
            ("encoder output mismatch", float(jnp.max(jnp.abs(a - b))))

    print("KERNEL_OK")
</pallas_src>

<mosaic_0001>
module attributes {stable_mosaic.version = 11 : i64} {
  func.func @_conv1d_fused_kernel(%arg0: i32, %arg1: i32, %arg2: memref<1x4x16xf32, #tpu.memory_space<vmem>>, %arg3: memref<8x4xf32, #tpu.memory_space<vmem>>, %arg4: memref<8x1xf32, #tpu.memory_space<vmem>>, %arg5: memref<1x8x16xf32, #tpu.memory_space<vmem>>) attributes {dimension_semantics = [#tpu.dimension_semantics<parallel>, #tpu.dimension_semantics<parallel>], iteration_bounds = array<i64: 2, 1>, scalar_prefetch = 0 : i64, scratch_operands = 0 : i64, tpu.core_type = #tpu.core_type<tc>, window_params = [{transform_indices = @transform_0, window_bounds = array<i64: 1, 4, 16>}, {pipeline_mode = #tpu.pipeline_mode<synchronous>, transform_indices = @transform_1, window_bounds = array<i64: 8, 4>}, {pipeline_mode = #tpu.pipeline_mode<synchronous>, transform_indices = @transform_2, window_bounds = array<i64: 8, 1>}, {transform_indices = @transform_3, window_bounds = array<i64: 1, 8, 16>}]} {
    %c0 = arith.constant 0 : index
    %c0_0 = arith.constant 0 : index
    %c0_1 = arith.constant 0 : index
    %0 = vector.load %arg2[%c0, %c0_0, %c0_1] : memref<1x4x16xf32, #tpu.memory_space<vmem>>, vector<1x4x16xf32>
    %1 = vector.shape_cast %0 : vector<1x4x16xf32> to vector<4x16xf32>
    %c0_2 = arith.constant 0 : index
    %c0_3 = arith.constant 0 : index
    %2 = vector.load %arg3[%c0_2, %c0_3] : memref<8x4xf32, #tpu.memory_space<vmem>>, vector<8x4xf32>
    %cst = arith.constant dense<0.000000e+00> : vector<8x16xf32>
    %3 = tpu.matmul %2, %1, %cst {dimension_numbers = #tpu.dot_dimension_numbers<[1], [0], [0], [1], [0, 0, 1, 1], [], []>} : vector<8x4xf32>, vector<4x16xf32>, vector<8x16xf32> -> vector<8x16xf32>
    %c0_4 = arith.constant 0 : index
    %c0_5 = arith.constant 0 : index
    %4 = vector.load %arg4[%c0_4, %c0_5] : memref<8x1xf32, #tpu.memory_space<vmem>>, vector<8x1xf32>
    %5 = vector.broadcast %4 : vector<8x1xf32> to vector<8x16xf32>
    %6 = arith.addf %3, %5 : vector<8x16xf32>
    %c0_6 = arith.constant 0 : index
    %c0_7 = arith.constant 0 : index
    %c0_8 = arith.constant 0 : index
    %7 = vector.load %arg5[%c0_6, %c0_7, %c0_8] : memref<1x8x16xf32, #tpu.memory_space<vmem>>, vector<1x8x16xf32>
    %8 = vector.shape_cast %7 : vector<1x8x16xf32> to vector<8x16xf32>
    %9 = vector.shape_cast %6 : vector<8x16xf32> to vector<1x8x16xf32>
    tpu.vector_store %arg5[%c0_6, %c0_7, %c0_8], %9 {strides = array<i32>} : memref<1x8x16xf32, #tpu.memory_space<vmem>>, vector<1x8x16xf32>,
    return
  }
  func.func @transform_0(%arg0: i32, %arg1: i32) -> (i32, i32, i32) {
    %c0_i32 = arith.constant 0 : i32
    %c0_i32_0 = arith.constant 0 : i32
    %c0_i32_1 = arith.constant 0 : i32
    return %arg0, %c0_i32, %c0_i32_0 : i32, i32, i32
  }
  func.func @transform_1(%arg0: i32, %arg1: i32) -> (i32, i32) {
    %c0_i32 = arith.constant 0 : i32
    %c0_i32_0 = arith.constant 0 : i32
    %c0_i32_1 = arith.constant 0 : i32
    return %c0_i32, %c0_i32_0 : i32, i32
  }
  func.func @transform_2(%arg0: i32, %arg1: i32) -> (i32, i32) {
    %c0_i32 = arith.constant 0 : i32
    %c0_i32_0 = arith.constant 0 : i32
    %c0_i32_1 = arith.constant 0 : i32
    return %c0_i32, %c0_i32_0 : i32, i32
  }
  func.func @transform_3(%arg0: i32, %arg1: i32) -> (i32, i32, i32) {
    %c0_i32 = arith.constant 0 : i32
    %c0_i32_0 = arith.constant 0 : i32
    return %arg0, %c0_i32, %arg1 : i32, i32, i32
  }
}

</mosaic_0001>

<bundles_post_ra>
// kernel: tpu_custom_call.1
= control target key start
LH: loop header
LB: loop body
LE: loop exit
PB: predicated region body
PF: predicated region fallthrough
CT: control target
= control target key end

     0   :  { %8 = vsyncpa [#allocation3], 0  ;;  %s577_s0 = inlined_call_operand.vmem [shape: f32[2,4,16], index: 0, kind: input, shape index: {}]   ;;  %s578_s1 = inlined_call_operand.vmem [shape: f32[8,4], index: 1, kind: input, shape index: {}]   ;;  %s579_s2 = inlined_call_operand.vmem [shape: f32[8,1], index: 2, kind: input, shape index: {}]   ;;  %s580_s3 = inlined_call_operand.hbm [shape: f32[2,8,16], index: 3, kind: output, shape index: {}]  }
   0x1   :  { %10 = vsyncpa [#allocation3 + $0x1], 0  ;;  %s474_s12 = smov 0   ;;  %s476_s13 = smov 0  }
   0x2   :  { %s478_s14 = smov 0   ;;  %s480_s15 = smov 0  }
   0x3   :  { %s482_s16 = smov 0   ;;  %s484_s17 = smov 0  }
   0x4 LB: > { %s303_s18 = sadd.s32 4294967295, %s451_s17   ;;  %s304_s19 = sadd.s32 4294967294, %s451_s17   ;;  %s451_s17 = sphi %s484_s17, %s16_s17   ;;  %s447_s16 = sphi %s482_s16, %s587_s16   ;;  %s443_s15 = sphi %s480_s15, %s586_s15   ;;  %s439_s14 = sphi %s478_s14, %s585_s14   ;;  %s435_s13 = sphi %s476_s13, %s584_s13   ;;  %s431_s12 = sphi %s474_s12, %s583_s12  }
   0x5   : > { %s28_s20 = sadd.s32 1, %s447_s16  ;;  %s105_s21 = sadd.s32 1, %s439_s14 }
   0x6   : > { %p30_p0 = scmp.ge.s32.totalorder %s28_s20, 2  ;;  %p115_p1 = scmp.ne.s32.totalorder %s439_s14, %s435_s13 }
   0x7   : > { %p116_p2 = scmp.eq.s32.totalorder %s303_s18, 1  ;;  %p121_p3 = scmp.ne.s32.totalorder %s435_s13, %s431_s12 }
   0x8   : > { %s589_s20 = smov (%p30_p0, %s28_s20), 0  ;;  %p122_p5 = scmp.eq.s32.totalorder %s304_s19, 1 }
   0x9   : > { %p514_p4 = por %p116_p2, %p115_p1  ;;  %s100_s23 = ssub.s32 %s447_s16, %s589_s20 }
   0xa   : > { %p307_p6 = scmp.ge.s32.totalorder %s451_s17, 1  ;;  %p103_p7 = scmp.eq.s32.totalorder %s100_s23, 0 }
   0xb   : > { %p521_p8 = por %p122_p5, %p121_p3  ;;  %p153_p9 = scmp.lt.s32.totalorder %s451_s17, 3 }
   0xc   : > { %s527_s25 = scalar_select %p103_p7, %s439_s14, %s105_s21  }
   0xd   : > { %p154_p10 = pnand %p307_p6, %p153_p9 }
   0xe   : > { %p176_p11 = scmp.lt.s32.totalorder (!%p154_p10), %s443_s15, 1  ;;  %s173_s8 = sand.u32 (!%p154_p10), 1, %s435_s13  }
   0xf   : > { %157 = sbr.rel (%p154_p10) target bundleno = 157 (0x9d), region = 32  ;;  %s308_s9 = sshll.u32 (!%p154_p10), %s173_s8, 3 }
  0x10   : > { %s313_s10 = sshll.u32 (!%p154_p10), %s443_s15, 3  ;;  %s175_s21 = scalar_lea.vmem (!%p154_p10), [#allocation2], %s308_s9 }
  0x11   : > { %s230_s19 = scalar_lea.hbm (!%p154_p10), %s580_s3, %s313_s10  ;;  %s232_s23 = sshll.u32 (!%p154_p10), %s175_s21, 4  ;;  %s233_s23 = int_to_ptr.vmem [resolvable:$true] %s232_s23 }
  0x12   : > { %s234_s26 = sshll.u32 (!%p154_p10), %s230_s19, 4  ;;  %s219_s27 = scalar_lea.sflag (!%p154_p10), [#allocation3], %s173_s8  ;;  %s235_s26 = int_to_ptr.hbm [resolvable:$true] %s234_s26 }
  0x13   : > { %s393_s4 = scalar_lea.hbm (!%p154_p10), %s580_s3, 16 }
  0x14   : > { %v182_v0 = vld [vmem:[%s579_s2] sm:$0xff]  ;;  %v453_v1 = vmov 0   ;;  %s177_s28 = scalar_select %p176_p11, %s443_s15, 1  ;;  %vm192_vm0 = vcmask 1043456   ;;  %vm188_vm1 = vcmask 31744   ;;  %vm216_vm2 = vcmask 130048  }
  0x15   : > { %372 = vset.pattern.permute.xlu0 %v453_v1  ;;  %v181_v2 = vld [vmem:[%s578_s1] sm:$0xff] }
  0x16   : > { %185 = vperm.xlu0 %372, %v182_v0   ;;  %s309_s29 = sshll.u32 %s177_s28, 2  ;;  %s387_s28 = sshra.s32 %s235_s26, 4  ;;  %s388_s28 = int_to_ptr.hbm [resolvable:$true] %s387_s28 }
  0x17   : > { %s179_s5 = scalar_lea.vmem %s577_s0, %s309_s29  ;;  %s389_s29 = scalar_lea.hbm %s388_s28, 8 }
  0x18   : > { %v180_v3 = vld [vmem:[%s179_s5] sm:$0xf]  ;;  %p390_p12 = scmp.ne.s32.totalorder %s388_s28, %s389_s29  ;;  %p394_p1 = scmp.lt.s32.totalorder %s388_s28, %s580_s3 }
  0x19   : > { %310 = vmatpush.msk.msra.mxu0 %vm192_vm0, %v180_v3  ;;  %p395_p2 = scmp.lt.s32.totalorder %s393_s4, %s389_s29 }
  0x1a   : > { %311 = vmatmul.msk.f32.vlgmr.msra.gmra.mxu0 %vm188_vm1, %v181_v2  ;;  %p391_p13 = pnand %p390_p12, %p514_p4 }
  0x1b   : > { %p396_p3 = por %p395_p2, %p394_p1 }
  0x1c   : > { %p392_p0 = pneg %p391_p13 }
  0x1e   : > { %p397_p5 = pnand %p396_p3, %p392_p0 }
  0x88   : > { %v186_v4 = vpop.permute.xlu0 %185 }
  0x97   : > { %v213_v5 = vpop.f32.mrf.mxu0 }
  0x98   : > { %v214_v6 = vadd.f32 %v213_v5, %v186_v4 }
  0x9a   : > { %217 = vst.msk [vmem:[%s175_s21] sm:$0xff] %vm216_vm2, %v214_v6 }
  0x9b   : > { %400 = shalt.err (!%p397_p5)
}
  0x9c   : > { %316 = dma.vmem_to_hbm [thread:$0]  (%p514_p4), %s233_s23, 128, %s235_s26, %s219_s27  }
  0x9d PF: > { %p322_p6 = scmp.ge.s32.totalorder %s451_s17, 2  ;;  %s246_s7 = sand.u32 1, %s431_s12  }
  0x9e   : > { %s247_s8 = scalar_lea.sflag [#allocation3], %s246_s7 }
  0x9f   : > { %p319_p7 = pnand %p322_p6, %p521_p8 }
  0xa1   : > { %p320_p9 = pneg %p319_p7 }
  0xa3   : > { %426 = dma.done.wait (%p320_p9), %s247_s8, 128  }
  0xa4   : > { %428 = vsyncadd (%p320_p9), %s247_s8, 4294967168  ;;  %s16_s17 = sadd.s32 1, %s451_s17   ;;  %s583_s12 = smov %s435_s13 }
  0xa5   : > { %p13_p10 = scmp.ge.s32.totalorder %s16_s17, 4   ;;  %s584_s13 = smov %s439_s14 }
  0xa6   : > { %s585_s14 = smov %s527_s25  ;;  %s586_s15 = smov %s447_s16 }
  0xa7   : > { %s587_s16 = smov %s589_s20  ;;  %15 = sbr.rel (!%p13_p10) target bundleno = 4 (0x4), region = 67 }
  0xac   :  { %253 = vsyncpa [#allocation3], 1 }
  0xad   :  { %255 = vsyncpa [#allocation3 + $0x1], 1 }

</bundles_post_ra>
